<compile_context>
chip_gen: v7x
topology: tpu7x:2x2x1
jax: 0.10.0
libtpu: 0.0.40
codegen_flags: <defaults>
</compile_context>

<pallas_src>
import functools
import math

import numpy as np
import jax
import jax.numpy as jnp
from jax import lax
from jax.experimental import pallas as pl
from jax.experimental.pallas import tpu as pltpu


_BIG = 1e30  # effectively +inf for masked (padded) entries of the distance matrix


# ----------------------------------------------------------------------------
# Pallas kernel: grid=(B, H); one head of one batch element per grid step.
# ----------------------------------------------------------------------------
def _chamfer_sde_kernel(planes_smem, pts_r_ref, pts_c_ref, out_ref, pd_ref,
                        *, n_valid):
    """planes_smem : (B, H*4) SMEM   normalized planes, flat [nx,ny,nz,d] per head
       pts_r_ref   : (1, 3, Npad)    points, xyz on sublanes, points on lanes
       pts_c_ref   : (1, Npad, 3)    points, points on sublanes (column layout)
       out_ref     : (1, 1, H)       per-head SDE row (resident across the h axis)
       pd_ref      : (Npad, Npad)    VMEM scratch: masked pairwise sq. distances
    """
    b = pl.program_id(0)
    h = pl.program_id(1)

    n_pad = pts_r_ref.shape[2]
    n_heads = out_ref.shape[2]

    x_row = pts_r_ref[0, 0:1, :]                  # (1, Npad)
    y_row = pts_r_ref[0, 1:2, :]
    z_row = pts_r_ref[0, 2:3, :]
    x_col = pts_c_ref[0, :, 0:1]                  # (Npad, 1)
    y_col = pts_c_ref[0, :, 1:2]
    z_col = pts_c_ref[0, :, 2:3]

    # ---- once per batch element: build the masked pairwise distance matrix ----
    # TODO(synk): for production clouds (N >~ 2048) tile the column (lane) axis
    # of pd/dh with running-min accumulators instead of materializing the full
    # (Npad, Npad) matrices (VMEM budget, esp. v7x's 64 MiB); optionally build
    # pd on the idle MXU via the Gram identity at those sizes.
    @pl.when(h == 0)
    def _():
        dx = x_col - x_row
        dy = y_col - y_row
        dz = z_col - z_row
        pd = dx * dx + dy * dy + dz * dz          # (Npad, Npad)
        if n_valid != n_pad:
            valid_row = lax.broadcasted_iota(jnp.int32, (1, n_pad), 1) < n_valid
            valid_col = lax.broadcasted_iota(jnp.int32, (n_pad, 1), 0) < n_valid
            # Hoisted mask: +BIG wherever row OR column is padding.  Safe for
            # both Chamfer directions because the post-reduction zeroing below
            # discards the padded rows/cols of min_f / min_b.
            pd = jnp.where(valid_row & valid_col, pd, _BIG)
        pd_ref[...] = pd
        out_ref[...] = jnp.zeros_like(out_ref)

    # ---- per head: scalar plane coefficients from SMEM ----
    base = 4 * h
    nx = planes_smem[b, base + 0]
    ny = planes_smem[b, base + 1]
    nz = planes_smem[b, base + 2]
    d = planes_smem[b, base + 3]

    # 2x prescale folded into the (Npad,)-sized vectors, so the big update is
    # exactly pd + t2_col * t2_row  (1 mul + 1 add per element per head).
    t2_row = 2.0 * (nx * x_row + ny * y_row + nz * z_row + d)   # (1, Npad)
    t2_col = 2.0 * (nx * x_col + ny * y_col + nz * z_col + d)   # (Npad, 1)

    dh = pd_ref[...] + t2_col * t2_row            # (Npad, Npad): ||R_h(p_i)-p_j||^2

    # forward: reflected point i -> nearest original point j
    min_f = jnp.min(dh, axis=1, keepdims=True)    # (Npad, 1)
    # backward: original point j -> nearest reflected point i
    min_b = jnp.min(dh, axis=0, keepdims=True)    # (1, Npad)
    if n_valid != n_pad:
        valid_row = lax.broadcasted_iota(jnp.int32, (1, n_pad), 1) < n_valid
        valid_col = lax.broadcasted_iota(jnp.int32, (n_pad, 1), 0) < n_valid
        min_f = jnp.where(valid_col, min_f, 0.0)
        min_b = jnp.where(valid_row, min_b, 0.0)

    inv_n = 1.0 / float(n_valid)
    val = (jnp.sum(min_f) + jnp.sum(min_b)) * inv_n

    # Single masked update of lane h of the resident (1,1,H) output block.
    lane = lax.broadcasted_iota(jnp.int32, (1, 1, n_heads), 2)
    out_ref[...] = jnp.where(lane == h, val, out_ref[...])


def chamfer_sde(y_pred_normalized, sample_points):
    """chamfer_adapter: returns the (B, H) bidirectional squared-Chamfer SDE."""
    B, H, _ = y_pred_normalized.shape
    _, N, _ = sample_points.shape
    n_pad = max(128, ((N + 127) // 128) * 128)    # lane-dense point axis

    pts = sample_points.astype(jnp.float32)                 # (B, N, 3)
    pts_r = jnp.transpose(pts, (0, 2, 1))                    # (B, 3, N)
    if n_pad != N:
        pts_r = jnp.pad(pts_r, ((0, 0), (0, 0), (0, n_pad - N)))
        pts_c = jnp.pad(pts, ((0, 0), (0, n_pad - N), (0, 0)))
    else:
        pts_c = pts

    planes_flat = y_pred_normalized.astype(jnp.float32).reshape(B, H * 4)

    # VMEM: pd scratch + one dh temp (+ reduction temps / input blocks).
    vmem_est = 4 * (n_pad * n_pad) * 4 + 8 * n_pad * 4 * 4
    vmem_limit = int(min(max(vmem_est, 32 * 1024 * 1024), 48 * 1024 * 1024))

    kernel = functools.partial(_chamfer_sde_kernel, n_valid=N)
    out = pl.pallas_call(
        kernel,
        out_shape=jax.ShapeDtypeStruct((B, 1, H), jnp.float32),
        grid_spec=pltpu.PrefetchScalarGridSpec(
            num_scalar_prefetch=0,
            grid=(B, H),
            in_specs=[
                pl.BlockSpec(memory_space=pltpu.MemorySpace.SMEM),   # planes_flat
                pl.BlockSpec((1, 3, n_pad), lambda b, h: (b, 0, 0)),  # row layout
                pl.BlockSpec((1, n_pad, 3), lambda b, h: (b, 0, 0)),  # column layout
            ],
            out_specs=pl.BlockSpec((1, 1, H), lambda b, h: (b, 0, 0)),
            scratch_shapes=[pltpu.VMEM((n_pad, n_pad), jnp.float32)],
        ),
        compiler_params=pltpu.CompilerParams(
            # B is safely parallel (one output block per b); H reuses the per-
            # batch pd scratch and the resident output row, so it is arbitrary.
            dimension_semantics=("parallel", "arbitrary"),
            vmem_limit_bytes=vmem_limit,
        ),
    )(planes_flat, pts_r, pts_c)
    return out[:, 0, :]


# ----------------------------------------------------------------------------
# Plain-JAX glue (cheap elementwise / tiny reductions)
# ----------------------------------------------------------------------------
def normalize_planes(y_pred):
    n = y_pred[..., 0:3]
    norm = jnp.linalg.norm(n, axis=-1, keepdims=True)
    return jnp.concatenate([n / norm, y_pred[..., 3:4]], axis=-1)


def transform_representation_cm(y_pred_n, sample_points):
    # TODO(synk): transform_representation_cm source not provided; assumed
    # semantics: (normal, d) -> (normal, point) with point = projection of the
    # sample-point center of mass onto the plane.
    cm = jnp.mean(sample_points, axis=1)                  # (B, 3)
    n = y_pred_n[..., 0:3]                                # (B, H, 3)
    d = y_pred_n[..., 3]                                  # (B, H)
    dist = jnp.einsum('bhk,bk->bh', n, cm) + d            # (B, H)
    point = cm[:, None, :] - dist[..., None] * n          # (B, H, 3)
    return jnp.concatenate([n, point], axis=-1)           # (B, H, 6)


def minmax_normalization(sde):
    mn = jnp.min(sde, axis=1, keepdims=True)
    shifted = sde - mn
    denom = jnp.abs(jnp.max(shifted, axis=1, keepdims=True))
    return 1.0 - shifted / denom


@jax.jit
def _device_stage(y_pred, sample_points):
    y_n = normalize_planes(y_pred)
    y_t = transform_representation_cm(y_n, sample_points)
    sde = chamfer_sde(y_n, sample_points)
    conf = minmax_normalization(sde)
    return y_n, y_t, sde, conf


# ----------------------------------------------------------------------------
# Host-side data-dependent post-processing (mirrors the PyTorch loops exactly)
# ----------------------------------------------------------------------------
class PredictedPlane:
    def __init__(self, normal, point, confidence, sde):
        self.normal = normal / np.linalg.norm(normal)
        self.point = point
        self.confidence = confidence
        self.sde = sde

    def is_close(self, another_plane, angle_threshold=30):
        angle = np.arccos(np.dot(self.normal, another_plane.normal)) * 180.0 / math.pi
        return bool((angle < angle_threshold) | (180.0 - angle < angle_threshold))

    def to_array(self):
        return np.concatenate(
            [self.normal, self.point,
             np.asarray([self.confidence], dtype=np.float32),
             np.asarray([self.sde], dtype=np.float32)], axis=0).astype(np.float32)


def remove_duplicated_pred_planes(curr_head_predictions, angle_threshold):
    pop_plane_idx = []
    for a_idx, a_plane in enumerate(curr_head_predictions):
        for b_idx, b_plane in enumerate(curr_head_predictions):
            if a_idx != b_idx and a_plane.is_close(b_plane, angle_threshold):
                if a_plane.sde > b_plane.sde:
                    pop_plane_idx.append(a_idx)
                else:
                    pop_plane_idx.append(b_idx)
    pop_plane_idx = sorted(list(set(pop_plane_idx)))
    for idx in reversed(pop_plane_idx):
        curr_head_predictions.pop(idx)
    return curr_head_predictions


class PlaneValidator:
    def __init__(self, sde_fn='chamfer', sde_threshold=0.01, angle_threshold=30):
        if sde_fn == 'symloss' or sde_fn is None:
            # TODO(synk): SymLoss.planar_reflective_sym_distance_loss source not
            # provided; only the 'chamfer' sde_fn is implemented.
            raise NotImplementedError("symloss sde_fn not available")
        elif sde_fn == 'chamfer':
            pass
        else:
            raise ValueError('Bad name sde_fn')
        self.sde_threshold = sde_threshold
        self.angle_threshold = angle_threshold

    def forward(self, batch, y_pred):
        idx, transformation_params, sample_points, voxel_grids, voxel_grids_cp, _ = batch
        _, y_t, sde, conf = _device_stage(y_pred, sample_points)

        y_t = np.asarray(y_t)
        sde = np.asarray(sde)
        conf = np.asarray(conf)
        bs, n_heads = sde.shape

        predictions = []
        for bidx in range(bs):
            curr = []
            for nidx in range(n_heads):
                plane = y_t[bidx, nidx, :]
                curr.append(PredictedPlane(normal=plane[0:3], point=plane[3:6],
                                           confidence=conf[bidx, nidx],
                                           sde=sde[bidx, nidx]))
            curr = [x for x in curr if x.sde <= self.sde_threshold]
            curr.sort(key=lambda x: x.confidence, reverse=True)
            curr = remove_duplicated_pred_planes(curr, self.angle_threshold)
            curr = [x.to_array() for x in curr]
            if len(curr) == 0:
                curr = [np.zeros(8, dtype=np.float32)]
            predictions.append(np.stack(curr, axis=0))

        # pad_sequence(batch_first=True)
        max_len = max(p.shape[0] for p in predictions)
        out = np.zeros((bs, max_len, 8), dtype=np.float32)
        for i, p in enumerate(predictions):
            out[i, :p.shape[0], :] = p
        return jnp.asarray(out)

    __call__ = forward


# ----------------------------------------------------------------------------
if __name__ == "__main__":
    key = jax.random.PRNGKey(0)
    k1, k2 = jax.random.split(key)

    B, H, N = 2, 8, 64
    y_pred = jax.random.normal(k1, (B, H, 4), dtype=jnp.float32)
    sample_points = jax.random.normal(k2, (B, N, 3), dtype=jnp.float32)

    batch = (
        jnp.arange(B, dtype=jnp.int32),                   # idx
        jnp.zeros((B, 4), dtype=jnp.float32),             # transformation_params
        sample_points,                                    # sample_points
        jnp.zeros((B, 1, 8, 8, 8), dtype=jnp.float32),    # voxel_grids
        jnp.zeros((B, 3, 8, 8, 8), dtype=jnp.float32),    # voxel_grids_cp
        None,                                             # unused
    )

    validator = PlaneValidator(sde_fn='chamfer', sde_threshold=10.0,
                               angle_threshold=30)
    out = validator(batch, y_pred)
    jax.block_until_ready(out)
    print("KERNEL_OK")
</pallas_src>

<mosaic_0001>
module attributes {stable_mosaic.version = 11 : i64} {
  func.func @_chamfer_sde_kernel(%arg0: i32, %arg1: i32, %arg2: memref<2x32xf32, #tpu.memory_space<smem>>, %arg3: memref<1x3x128xf32, #tpu.memory_space<vmem>>, %arg4: memref<1x128x3xf32, #tpu.memory_space<vmem>>, %arg5: memref<1x1x8xf32, #tpu.memory_space<vmem>>, %arg6: memref<128x128xf32, #tpu.memory_space<vmem>>) attributes {dimension_semantics = [#tpu.dimension_semantics<parallel>, #tpu.dimension_semantics<arbitrary>], iteration_bounds = array<i64: 2, 8>, scalar_prefetch = 0 : i64, scratch_operands = 1 : i64, tpu.core_type = #tpu.core_type<tc>, window_params = [{transform_indices = @transform_0, window_bounds = array<i64: 2, 32>}, {transform_indices = @transform_1, window_bounds = array<i64: 1, 3, 128>}, {transform_indices = @transform_2, window_bounds = array<i64: 1, 128, 3>}, {transform_indices = @transform_3, window_bounds = array<i64: 1, 1, 8>}]} {
    %c0 = arith.constant 0 : index
    %c0_0 = arith.constant 0 : index
    %c0_1 = arith.constant 0 : index
    %0 = vector.load %arg3[%c0, %c0_0, %c0_1] : memref<1x3x128xf32, #tpu.memory_space<vmem>>, vector<1x1x128xf32>
    %1 = vector.shape_cast %0 : vector<1x1x128xf32> to vector<1x128xf32>
    %c0_2 = arith.constant 0 : index
    %c1 = arith.constant 1 : index
    %c0_3 = arith.constant 0 : index
    %2 = vector.load %arg3[%c0_2, %c1, %c0_3] : memref<1x3x128xf32, #tpu.memory_space<vmem>>, vector<1x1x128xf32>
    %3 = vector.shape_cast %2 : vector<1x1x128xf32> to vector<1x128xf32>
    %c0_4 = arith.constant 0 : index
    %c2 = arith.constant 2 : index
    %c0_5 = arith.constant 0 : index
    %4 = vector.load %arg3[%c0_4, %c2, %c0_5] : memref<1x3x128xf32, #tpu.memory_space<vmem>>, vector<1x1x128xf32>
    %5 = vector.shape_cast %4 : vector<1x1x128xf32> to vector<1x128xf32>
    %c0_6 = arith.constant 0 : index
    %c0_7 = arith.constant 0 : index
    %c0_8 = arith.constant 0 : index
    %6 = vector.load %arg4[%c0_6, %c0_7, %c0_8] : memref<1x128x3xf32, #tpu.memory_space<vmem>>, vector<1x128x1xf32>
    %7 = vector.shape_cast %6 : vector<1x128x1xf32> to vector<128x1xf32>
    %c0_9 = arith.constant 0 : index
    %c0_10 = arith.constant 0 : index
    %c1_11 = arith.constant 1 : index
    %8 = vector.load %arg4[%c0_9, %c0_10, %c1_11] : memref<1x128x3xf32, #tpu.memory_space<vmem>>, vector<1x128x1xf32>
    %9 = vector.shape_cast %8 : vector<1x128x1xf32> to vector<128x1xf32>
    %c0_12 = arith.constant 0 : index
    %c0_13 = arith.constant 0 : index
    %c2_14 = arith.constant 2 : index
    %10 = vector.load %arg4[%c0_12, %c0_13, %c2_14] : memref<1x128x3xf32, #tpu.memory_space<vmem>>, vector<1x128x1xf32>
    %11 = vector.shape_cast %10 : vector<1x128x1xf32> to vector<128x1xf32>
    %c0_i32 = arith.constant 0 : i32
    %12 = arith.cmpi eq, %arg1, %c0_i32 : i32
    %13 = arith.extui %12 : i1 to i32
    %c0_i32_15 = arith.constant 0 : i32
    %14 = arith.cmpi ne, %13, %c0_i32_15 : i32
    scf.if %14 {
      %92 = vector.broadcast %7 : vector<128x1xf32> to vector<128x128xf32>
      %93 = vector.broadcast %1 : vector<1x128xf32> to vector<128x128xf32>
      %94 = arith.subf %92, %93 : vector<128x128xf32>
      %95 = vector.broadcast %9 : vector<128x1xf32> to vector<128x128xf32>
      %96 = vector.broadcast %3 : vector<1x128xf32> to vector<128x128xf32>
      %97 = arith.subf %95, %96 : vector<128x128xf32>
      %98 = vector.broadcast %11 : vector<128x1xf32> to vector<128x128xf32>
      %99 = vector.broadcast %5 : vector<1x128xf32> to vector<128x128xf32>
      %100 = arith.subf %98, %99 : vector<128x128xf32>
      %101 = arith.mulf %94, %94 : vector<128x128xf32>
      %102 = arith.mulf %97, %97 : vector<128x128xf32>
      %103 = arith.addf %101, %102 : vector<128x128xf32>
      %104 = arith.mulf %100, %100 : vector<128x128xf32>
      %105 = arith.addf %103, %104 : vector<128x128xf32>
      %106 = tpu.iota {dimensions = array<i32: 1>} : vector<1x128xi32>
      %c64_i32_34 = arith.constant 64 : i32
      %107 = vector.broadcast %c64_i32_34 : i32 to vector<1x128xi32>
      %108 = arith.cmpi slt, %106, %107 : vector<1x128xi32>
      %109 = tpu.iota {dimensions = array<i32: 0>} : vector<128x1xi32>
      %c64_i32_35 = arith.constant 64 : i32
      %110 = vector.broadcast %c64_i32_35 : i32 to vector<128x1xi32>
      %111 = arith.cmpi slt, %109, %110 : vector<128x1xi32>
      %112 = vector.broadcast %108 : vector<1x128xi1> to vector<128x128xi1>
      %113 = vector.broadcast %111 : vector<128x1xi1> to vector<128x128xi1>
      %114 = arith.andi %112, %113 : vector<128x128xi1>
      %cst_36 = arith.constant 1.000000e+30 : f32
      %115 = vector.broadcast %cst_36 : f32 to vector<128x128xf32>
      %116 = arith.select %114, %105, %115 : vector<128x128xi1>, vector<128x128xf32>
      %c0_37 = arith.constant 0 : index
      %c0_38 = arith.constant 0 : index
      %117 = vector.load %arg6[%c0_37, %c0_38] : memref<128x128xf32, #tpu.memory_space<vmem>>, vector<128x128xf32>
      tpu.vector_store %arg6[%c0_37, %c0_38], %116 {strides = array<i32>} : memref<128x128xf32, #tpu.memory_space<vmem>>, vector<128x128xf32>,
      %cst_39 = arith.constant 0.000000e+00 : f32
      %118 = vector.broadcast %cst_39 : f32 to vector<1x1x8xf32>
      %c0_40 = arith.constant 0 : index
      %c0_41 = arith.constant 0 : index
      %c0_42 = arith.constant 0 : index
      %119 = vector.load %arg5[%c0_40, %c0_41, %c0_42] : memref<1x1x8xf32, #tpu.memory_space<vmem>>, vector<1x1x8xf32>
      tpu.vector_store %arg5[%c0_40, %c0_41, %c0_42], %118 {strides = array<i32>} : memref<1x1x8xf32, #tpu.memory_space<vmem>>, vector<1x1x8xf32>,
    } else {
    }
    %c4_i32 = arith.constant 4 : i32
    %15 = arith.muli %c4_i32, %arg1 : i32
    %c0_i32_16 = arith.constant 0 : i32
    %16 = arith.addi %15, %c0_i32_16 : i32
    %17 = arith.index_cast %arg0 : i32 to index
    %18 = arith.index_cast %16 : i32 to index
    %19 = memref.load %arg2[%17, %18] : memref<2x32xf32, #tpu.memory_space<smem>>
    %c1_i32 = arith.constant 1 : i32
    %20 = arith.addi %15, %c1_i32 : i32
    %21 = arith.index_cast %arg0 : i32 to index
    %22 = arith.index_cast %20 : i32 to index
    %23 = memref.load %arg2[%21, %22] : memref<2x32xf32, #tpu.memory_space<smem>>
    %c2_i32 = arith.constant 2 : i32
    %24 = arith.addi %15, %c2_i32 : i32
    %25 = arith.index_cast %arg0 : i32 to index
    %26 = arith.index_cast %24 : i32 to index
    %27 = memref.load %arg2[%25, %26] : memref<2x32xf32, #tpu.memory_space<smem>>
    %c3_i32 = arith.constant 3 : i32
    %28 = arith.addi %15, %c3_i32 : i32
    %29 = arith.index_cast %arg0 : i32 to index
    %30 = arith.index_cast %28 : i32 to index
    %31 = memref.load %arg2[%29, %30] : memref<2x32xf32, #tpu.memory_space<smem>>
    %32 = vector.broadcast %19 : f32 to vector<1x128xf32>
    %33 = arith.mulf %32, %1 : vector<1x128xf32>
    %34 = vector.broadcast %23 : f32 to vector<1x128xf32>
    %35 = arith.mulf %34, %3 : vector<1x128xf32>
    %36 = arith.addf %33, %35 : vector<1x128xf32>
    %37 = vector.broadcast %27 : f32 to vector<1x128xf32>
    %38 = arith.mulf %37, %5 : vector<1x128xf32>
    %39 = arith.addf %36, %38 : vector<1x128xf32>
    %40 = vector.broadcast %31 : f32 to vector<1x128xf32>
    %41 = arith.addf %39, %40 : vector<1x128xf32>
    %cst = arith.constant 2.000000e+00 : f32
    %42 = vector.broadcast %cst : f32 to vector<1x128xf32>
    %43 = arith.mulf %42, %41 : vector<1x128xf32>
    %44 = vector.broadcast %19 : f32 to vector<128x1xf32>
    %45 = arith.mulf %44, %7 : vector<128x1xf32>
    %46 = vector.broadcast %23 : f32 to vector<128x1xf32>
    %47 = arith.mulf %46, %9 : vector<128x1xf32>
    %48 = arith.addf %45, %47 : vector<128x1xf32>
    %49 = vector.broadcast %27 : f32 to vector<128x1xf32>
    %50 = arith.mulf %49, %11 : vector<128x1xf32>
    %51 = arith.addf %48, %50 : vector<128x1xf32>
    %52 = vector.broadcast %31 : f32 to vector<128x1xf32>
    %53 = arith.addf %51, %52 : vector<128x1xf32>
    %cst_17 = arith.constant 2.000000e+00 : f32
    %54 = vector.broadcast %cst_17 : f32 to vector<128x1xf32>
    %55 = arith.mulf %54, %53 : vector<128x1xf32>
    %c0_18 = arith.constant 0 : index
    %c0_19 = arith.constant 0 : index
    %56 = vector.load %arg6[%c0_18, %c0_19] : memref<128x128xf32, #tpu.memory_space<vmem>>, vector<128x128xf32>
    %57 = vector.broadcast %55 : vector<128x1xf32> to vector<128x128xf32>
    %58 = vector.broadcast %43 : vector<1x128xf32> to vector<128x128xf32>
    %59 = arith.mulf %57, %58 : vector<128x128xf32>
    %60 = arith.addf %56, %59 : vector<128x128xf32>
    %cst_20 = arith.constant dense<0x7F800000> : vector<128xf32>
    %61 = vector.multi_reduction <minimumf>, %60, %cst_20 [1] : vector<128x128xf32> to vector<128xf32>
    %62 = vector.shape_cast %61 : vector<128xf32> to vector<128x1xf32>
    %cst_21 = arith.constant dense<0x7F800000> : vector<128xf32>
    %63 = vector.multi_reduction <minimumf>, %60, %cst_21 [0] : vector<128x128xf32> to vector<128xf32>
    %64 = vector.shape_cast %63 : vector<128xf32> to vector<1x128xf32>
    %65 = tpu.iota {dimensions = array<i32: 1>} : vector<1x128xi32>
    %c64_i32 = arith.constant 64 : i32
    %66 = vector.broadcast %c64_i32 : i32 to vector<1x128xi32>
    %67 = arith.cmpi slt, %65, %66 : vector<1x128xi32>
    %68 = tpu.iota {dimensions = array<i32: 0>} : vector<128x1xi32>
    %c64_i32_22 = arith.constant 64 : i32
    %69 = vector.broadcast %c64_i32_22 : i32 to vector<128x1xi32>
    %70 = arith.cmpi slt, %68, %69 : vector<128x1xi32>
    %cst_23 = arith.constant 0.000000e+00 : f32
    %71 = vector.broadcast %cst_23 : f32 to vector<128x1xf32>
    %72 = arith.select %70, %62, %71 : vector<128x1xi1>, vector<128x1xf32>
    %cst_24 = arith.constant 0.000000e+00 : f32
    %73 = vector.broadcast %cst_24 : f32 to vector<1x128xf32>
    %74 = arith.select %67, %64, %73 : vector<1x128xi1>, vector<1x128xf32>
    %75 = vector.shape_cast %72 : vector<128x1xf32> to vector<1x128x1xf32>
    %cst_25 = arith.constant dense<0.000000e+00> : vector<1xf32>
    %76 = vector.multi_reduction <add>, %75, %cst_25 [1, 2] : vector<1x128x1xf32> to vector<1xf32>
    %77 = vector.shape_cast %76 : vector<1xf32> to vector<1x1x1xf32>
    %78 = vector.extract %77[0, 0, 0] : f32 from vector<1x1x1xf32>
    %79 = vector.shape_cast %74 : vector<1x128xf32> to vector<1x1x128xf32>
    %cst_26 = arith.constant dense<0.000000e+00> : vector<1xf32>
    %80 = vector.multi_reduction <add>, %79, %cst_26 [1, 2] : vector<1x1x128xf32> to vector<1xf32>
    %81 = vector.shape_cast %80 : vector<1xf32> to vector<1x1x1xf32>
    %82 = vector.extract %81[0, 0, 0] : f32 from vector<1x1x1xf32>
    %83 = arith.addf %78, %82 : f32
    %cst_27 = arith.constant 1.562500e-02 : f32
    %84 = arith.mulf %83, %cst_27 : f32
    %85 = tpu.iota {dimensions = array<i32: 2>} : vector<1x1x8xi32>
    %86 = vector.broadcast %arg1 : i32 to vector<1x1x8xi32>
    %87 = arith.cmpi eq, %85, %86 : vector<1x1x8xi32>
    %c0_28 = arith.constant 0 : index
    %c0_29 = arith.constant 0 : index
    %c0_30 = arith.constant 0 : index
    %88 = vector.load %arg5[%c0_28, %c0_29, %c0_30] : memref<1x1x8xf32, #tpu.memory_space<vmem>>, vector<1x1x8xf32>
    %89 = vector.broadcast %84 : f32 to vector<1x1x8xf32>
    %90 = arith.select %87, %89, %88 : vector<1x1x8xi1>, vector<1x1x8xf32>
    %c0_31 = arith.constant 0 : index
    %c0_32 = arith.constant 0 : index
    %c0_33 = arith.constant 0 : index
    %91 = vector.load %arg5[%c0_31, %c0_32, %c0_33] : memref<1x1x8xf32, #tpu.memory_space<vmem>>, vector<1x1x8xf32>
    tpu.vector_store %arg5[%c0_31, %c0_32, %c0_33], %90 {strides = array<i32>} : memref<1x1x8xf32, #tpu.memory_space<vmem>>, vector<1x1x8xf32>,
    return
  }
  func.func @transform_0(%arg0: i32, %arg1: i32) -> (i32, i32) {
    %c0_i32 = arith.constant 0 : i32
    %c0_i32_0 = arith.constant 0 : i32
    %c0_i32_1 = arith.constant 0 : i32
    return %c0_i32, %c0_i32_0 : i32, i32
  }
  func.func @transform_1(%arg0: i32, %arg1: i32) -> (i32, i32, i32) {
    %c0_i32 = arith.constant 0 : i32
    %c0_i32_0 = arith.constant 0 : i32
    %c0_i32_1 = arith.constant 0 : i32
    return %arg0, %c0_i32, %c0_i32_0 : i32, i32, i32
  }
  func.func @transform_2(%arg0: i32, %arg1: i32) -> (i32, i32, i32) {
    %c0_i32 = arith.constant 0 : i32
    %c0_i32_0 = arith.constant 0 : i32
    %c0_i32_1 = arith.constant 0 : i32
    return %arg0, %c0_i32, %c0_i32_0 : i32, i32, i32
  }
  func.func @transform_3(%arg0: i32, %arg1: i32) -> (i32, i32, i32) {
    %c0_i32 = arith.constant 0 : i32
    %c0_i32_0 = arith.constant 0 : i32
    %c0_i32_1 = arith.constant 0 : i32
    return %arg0, %c0_i32, %c0_i32_0 : i32, i32, i32
  }
}

</mosaic_0001>

<bundles_post_ra>
// kernel: _device_stage.1
= control target key start
LH: loop header
LB: loop body
LE: loop exit
PB: predicated region body
PF: predicated region fallthrough
CT: control target
= control target key end

     0   :  { %8 = vsyncpa [#allocation4], 0  ;;  %s1548_s12 = smov 0   ;;  %s1550_s13 = smov 0   ;;  %s1971_s0 = inlined_call_operand.vmem [shape: f32[2,32], index: 0, kind: input, shape index: {}]   ;;  %s1972_s1 = inlined_call_operand.vmem [shape: f32[2,3,128], index: 1, kind: input, shape index: {}]   ;;  %s1973_s2 = inlined_call_operand.vmem [shape: f32[2,128,3], index: 2, kind: input, shape index: {}]   ;;  %s1974_s3 = inlined_call_operand.vmem [shape: f32[2,1,8], index: 3, kind: output, shape index: {}]  }
   0x1   :  { %s1552_s14 = smov 0   ;;  %s1554_s15 = smov 0  }
   0x2   :  { %s1556_s16 = smov 0  }
   0x3 LB: > { %s1370_s17 = sadd.s32 4294967295, %s1517_s16   ;;  %s23_s18 = sadd.s32 1, %s1509_s14  ;;  %s1517_s16 = sphi %s1556_s16, %s14_s16   ;;  %s1513_s15 = sphi %s1554_s15, %s1980_s15   ;;  %s1509_s14 = sphi %s1552_s14, %s1979_s14   ;;  %s1505_s13 = sphi %s1550_s13, %s1978_s13   ;;  %s1501_s12 = sphi %s1548_s12, %s1977_s12  }
   0x4   : > { %p24_p0 = scmp.ge.s32.totalorder %s23_s18, 8  ;;  %s26_s19 = sadd.s32 1, %s1513_s15 }
   0x5   : > { %p1372_p1 = scmp.ge.s32.totalorder %s1517_s16, 1  ;;  %p130_p2 = scmp.lt.s32.totalorder %s1517_s16, 17 }
   0x6   : > { %s1982_s18 = smov (%p24_p0, %s23_s18), 0  ;;  %s1984_s19 = smov (!%p24_p0, %s26_s19), %s1513_s15 }
   0x7   : > { %p1581_p3 = pnand %p1372_p1, %p130_p2  ;;  %p28_p4 = scmp.ge.s32.totalorder %s1984_s19, 2 }
   0x8   : > { %p1585_p5 = scmp.eq.s32.totalorder %s1370_s17, 0  ;;  %s143_s24 = sshll.u32 %s1971_s0, 4  ;;  %s144_s24 = int_to_ptr.vmem [resolvable:$true] %s143_s24 }
   0x9   : > { %p1397_p6 = pneg %p1581_p3  ;;  %s1986_s19 = smov (%p28_p4, %s1984_s19), 0 }
   0xa   : > { %s1460_s25 = scalar_lea.vmem %s144_s24, 32  ;;  %p1468_p12 = scmp.lt.s32.totalorder %s144_s24, %s144_s24 }
   0xb   : > { %p1398_p7 = pnand %p1585_p5, %p1397_p6  ;;  %p1461_p8 = scmp.ne.s32.totalorder %s144_s24, %s1460_s25 }
   0xc   : > { %p1469_p13 = scmp.lt.s32.totalorder %s1460_s25, %s1460_s25 }
   0xd   : > { %p1462_p9 = pneg %p1398_p7 }
   0xe   : > { %p1470_p0 = por %p1469_p13, %p1468_p12 }
   0xf   : > { %p1463_p10 = pnand %p1462_p9, %p1461_p8 }
  0x11   : > { %p1464_p11 = pneg %p1463_p10 }
  0x13   : > { %p1471_p1 = pnand %p1470_p0, %p1464_p11 }
  0x15   : > { %1474 = shalt.err (!%p1471_p1)
}
  0x16   : > { %s1519_s26 = smov [#allocation3]   ;;  %171 = sbr.rel (%p1581_p3) target bundleno = 881 (0x371), region = 32 }
  0x17   : > { %1400 = dma.vmem_to_smem (!%p1398_p7), %s144_s24, 32, %s1519_s26, [#allocation4]  }
  0x1d   : > { %1496 = dma.done.wait (%p1585_p5), [#allocation4], 32  }
  0x1e   : > { %1498 = vsyncadd (%p1585_p5), [#allocation4], 4294967264 }
  0x1f   : > { %177 = sfence }
  0x20   : > { %p198_p2 = scmp.lt.s32.totalorder %s1505_s13, 1  ;;  %p1380_p3 = scmp.ne.s32.totalorder %s1501_s12, 0 }
  0x21   : > { %v1520_v19 = vmov (!%p1380_p3), 0   ;;  %v1521_v20 = vmov (!%p1380_p3), 1   ;;  %v1522_v21 = vmov (!%p1380_p3), 2   ;;  %vm699_vm0 = vcmask (!%p1380_p3), 57344  }
  0x22   : > { %s199_s27 = scalar_select %p198_p2, %s1505_s13, 1 }
  0x23   : > { %1453 = vset.pattern.permute.xlu1 (!%p1380_p3), %v1520_v19  ;;  %1452 = vset.pattern.permute.xlu0 (!%p1380_p3), %v1520_v19  ;;  %v1523_v22 = vmov (!%p1380_p3), 1e+30   ;;  %v1524_v23 = vmov (!%p1380_p3), 0.0   ;;  %v313_v32 = vlaneseq (!%p1380_p3) }
  0x24   : > { %s1377_s28 = sshll.u32 %s199_s27, 2  ;;  %s1388_s29 = sshll.u32 %s199_s27, 7  ;;  %691 = vst [vmem:[#allocation2 + $0x40] sm:$0xff] (!%p1380_p3), %v1523_v22  ;;  %692 = vst [vmem:[#allocation2 + $0x48] sm:$0xff] (!%p1380_p3), %v1523_v22 }
  0x25   : > { %s201_s5 = scalar_lea.vmem %s1972_s1, %s1377_s28  ;;  %s206_s8 = scalar_lea.vmem %s1973_s2, %s1388_s29  ;;  %693 = vst [vmem:[#allocation2 + $0x50] sm:$0xff] (!%p1380_p3), %v1523_v22  ;;  %694 = vst [vmem:[#allocation2 + $0x58] sm:$0xff] (!%p1380_p3), %v1523_v22  ;;  %v314_v35 = vshrl.u32 (!%p1380_p3), %v313_v32, 7  ;;  %v1693_v47 = vand.u32 (!%p1380_p3), 127, %v313_v32 }
  0x26   : > { %s1615_s11 = scalar_lea.vmem %s1974_s3, %s199_s27  ;;  %v1617_v0 = vld [vmem:[%s201_s5] sm:$0x1]  ;;  %v1619_v1 = vld [vmem:[%s201_s5 + $0x1] sm:$0x1]  ;;  %v1621_v2 = vld [vmem:[%s201_s5 + $0x2] sm:$0x1] }
  0x27   : > { %v1623_v3 = vld [vmem:[%s206_s8] sm:$0xff]  ;;  %v1625_v4 = vld [vmem:[%s206_s8 + $0x8] sm:$0xff]  ;;  %v1627_v5 = vld [vmem:[%s206_s8 + $0x10] sm:$0xff]  ;;  %232 = sbr.rel (%p1380_p3) target bundleno = 226 (0xe2), region = 40  ;;  %695 = vst [vmem:[#allocation2 + $0x60] sm:$0xff] (!%p1380_p3), %v1523_v22  ;;  %v315_v38 = vsub.s32 (!%p1380_p3), 0, %v314_v35 }
  0x28   : > { %v1629_v6 = vld [vmem:[%s206_s8 + $0x18] sm:$0xff]  ;;  %v1631_v7 = vld [vmem:[%s206_s8 + $0x20] sm:$0xff]  ;;  %v1633_v8 = vld [vmem:[%s206_s8 + $0x28] sm:$0xff]  ;;  %245 = vperm.xlu1 (!%p1380_p3), %1453, %v1627_v5   ;;  %235 = vperm.xlu0 (!%p1380_p3), %1452, %v1623_v3   ;;  %696 = vst [vmem:[#allocation2 + $0x68] sm:$0xff] (!%p1380_p3), %v1523_v22  ;;  %vm583_vm1 = vcmp.lt.s32.totalorder (!%p1380_p3), %v1693_v47, 64 }
  0x29   : > { %v1635_v9 = vld [vmem:[%s206_s8 + $0x30] sm:$0xff]  ;;  %v1637_v10 = vld [vmem:[%s206_s8 + $0x38] sm:$0xff]  ;;  %v1639_v11 = vld [vmem:[%s206_s8 + $0x40] sm:$0xff]  ;;  %697 = vst [vmem:[#allocation2 + $0x70] sm:$0xff] (!%p1380_p3), %v1523_v22  ;;  %v1686_v39 = vrot.slane (!%p1380_p3), %v1619_v1, %v315_v38  ;;  %v1689_v42 = vrot.slane (!%p1380_p3), %v1617_v0, %v315_v38  ;;  %v1698_v50 = vrot.slane (!%p1380_p3), %v1621_v2, %v315_v38 }
  0x2a   : > { %v1641_v12 = vld [vmem:[%s206_s8 + $0x48] sm:$0xff]  ;;  %v1643_v13 = vld [vmem:[%s206_s8 + $0x50] sm:$0xff]  ;;  %v1645_v14 = vld [vmem:[%s206_s8 + $0x58] sm:$0xff]  ;;  %698 = vst [vmem:[#allocation2 + $0x78] sm:$0xff] (!%p1380_p3), %v1523_v22 }
  0x2b   : > { %v1647_v15 = vld [vmem:[%s206_s8 + $0x60] sm:$0xff]  ;;  %v1649_v16 = vld [vmem:[%s206_s8 + $0x68] sm:$0xff]  ;;  %v1651_v17 = vld [vmem:[%s206_s8 + $0x70] sm:$0xff]  ;;  %700 = vst.msk [vmem:[%s1615_s11] sm:$0x1] (!%p1380_p3), %vm699_vm0, %v1524_v23 }
  0x2c   : > { %v1653_v18 = vld [vmem:[%s206_s8 + $0x78] sm:$0xff]  ;;  %250 = vperm.xlu1 (!%p1380_p3), %1453, %v1629_v6   ;;  %240 = vperm.xlu0 (!%p1380_p3), %1452, %v1625_v4  }
  0x30   : > { %260 = vperm.xlu1 %1453, %v1633_v8   ;;  %255 = vperm.xlu0 %1452, %v1631_v7  }
  0x34   : > { %270 = vperm.xlu1 %1453, %v1637_v10   ;;  %265 = vperm.xlu0 %1452, %v1635_v9  }
  0x38   : > { %1455 = vset.pattern.permute.xlu1 %v1521_v20  ;;  %1454 = vset.pattern.permute.xlu0 %v1521_v20 }
  0x39   : > { %338 = vperm.xlu1 %1455, %v1625_v4   ;;  %334 = vperm.xlu0 %1454, %v1623_v3  }
  0x3d   : > { %342 = vperm.xlu1 %1455, %v1627_v5   ;;  %346 = vperm.xlu0 %1454, %v1629_v6  }
  0x41   : > { %350 = vperm.xlu1 %1455, %v1631_v7   ;;  %354 = vperm.xlu0 %1454, %v1633_v8  }
  0x45   : > { %358 = vperm.xlu1 %1455, %v1635_v9   ;;  %362 = vperm.xlu0 %1454, %v1637_v10  }
  0x49   : > { %1456 = vset.pattern.permute.xlu1 %v1522_v21  ;;  %1457 = vset.pattern.permute.xlu0 %v1522_v21 }
  0x4a   : > { %418 = vperm.xlu1 %1456, %v1623_v3   ;;  %422 = vperm.xlu0 %1457, %v1625_v4  }
  0x4e   : > { %426 = vperm.xlu1 %1456, %v1627_v5   ;;  %434 = vperm.xlu0 %1457, %v1631_v7  }
  0x52   : > { %430 = vperm.xlu1 %1456, %v1629_v6   ;;  %442 = vperm.xlu0 %1457, %v1635_v9  }
  0x56   : > { %438 = vperm.xlu1 %1456, %v1633_v8  }
  0x5a   : > { %446 = vperm.xlu1 %1456, %v1637_v10  }
  0xa7   : > { %v246_v24 = vpop.permute.xlu1 %245  ;;  %v236_v25 = vpop.permute.xlu0 %235 }
  0xa8   : > { %v317_v48 = vsub.f32 %v236_v25, %v1689_v42  ;;  %v319_v51 = vsub.f32 %v246_v24, %v1689_v42 }
  0xaa   : > { %v501_v60 = vmul.f32 %v317_v48, %v317_v48  ;;  %v503_v19 = vmul.f32 %v319_v51, %v319_v51 }
  0xab   : > { %v251_v26 = vpop.permute.xlu1 %250  ;;  %v241_v27 = vpop.permute.xlu0 %240 }
  0xac   : > { %v318_v49 = vsub.f32 %v241_v27, %v1689_v42 }
  0xae   : > { %v502_v61 = vmul.f32 %v318_v49, %v318_v49 }
  0xaf   : > { %v1681_v28 = vpop.permute.xlu1 %260  ;;  %v256_v29 = vpop.permute.xlu0 %255 }
  0xb0   : > { %v321_v56 = vsub.f32 %v256_v29, %v1689_v42  ;;  %v320_v29 = vsub.f32 %v251_v26, %v1689_v42 }
  0xb2   : > { %v505_v32 = vmul.f32 %v321_v56, %v321_v56 }
  0xb3   : > { %v1683_v30 = vpop.permute.xlu1 %270  ;;  %v266_v31 = vpop.permute.xlu0 %265 }
  0xb8   : > { %v339_v33 = vpop.permute.xlu1 %338  ;;  %v335_v34 = vpop.permute.xlu0 %334 }
  0xb9   : > { %v402_v43 = vsub.f32 %v339_v33, %v1686_v39  ;;  %v401_v44 = vsub.f32 %v335_v34, %v1686_v39  ;;  %v323_v33 = vsub.f32 %v266_v31, %v1689_v42 }
  0xbb   : > { %v518_v54 = vmul.f32 %v402_v43, %v402_v43  ;;  %v517_v55 = vmul.f32 %v401_v44, %v401_v44 }
  0xbc   : > { %v343_v36 = vpop.permute.xlu1 %342  ;;  %v347_v37 = vpop.permute.xlu0 %346 }
  0xbd   : > { %v403_v52 = vsub.f32 %v343_v36, %v1686_v39  ;;  %v404_v57 = vsub.f32 %v347_v37, %v1686_v39  ;;  %v534_v23 = vadd.f32 %v518_v54, %v502_v61  ;;  %v533_v24 = vadd.f32 %v517_v55, %v501_v60 }
  0xbe   : > { %v322_v54 = vsub.f32 %v1681_v28, %v1689_v42  ;;  %v507_v55 = vmul.f32 %v323_v33, %v323_v33 }
  0xbf   : > { %v519_v20 = vmul.f32 %v403_v52, %v403_v52  ;;  %v520_v34 = vmul.f32 %v404_v57, %v404_v57 }
  0xc0   : > { %v351_v40 = vpop.permute.xlu1 %350  ;;  %v355_v41 = vpop.permute.xlu0 %354 }
  0xc1   : > { %v405_v53 = vsub.f32 %v351_v40, %v1686_v39  ;;  %v535_v44 = vadd.f32 %v519_v20, %v503_v19  ;;  %v406_v48 = vsub.f32 %v355_v41, %v1686_v39 }
  0xc3   : > { %v521_v21 = vmul.f32 %v405_v53, %v405_v53  ;;  %v504_v53 = vmul.f32 %v320_v29, %v320_v29 }
  0xc4   : > { %v359_v45 = vpop.permute.xlu1 %358  ;;  %v363_v46 = vpop.permute.xlu0 %362 }
  0xc5   : > { %v407_v22 = vsub.f32 %v359_v45, %v1686_v39  ;;  %v537_v45 = vadd.f32 %v521_v21, %v505_v32  ;;  %v536_v61 = vadd.f32 %v520_v34, %v504_v53  ;;  %v408_v19 = vsub.f32 %v363_v46, %v1686_v39 }
  0xc7   : > { %v523_v49 = vmul.f32 %v407_v22, %v407_v22  ;;  %v524_v46 = vmul.f32 %v408_v19, %v408_v19 }
  0xc9   : > { %v419_v58 = vpop.permute.xlu1 %418  ;;  %v423_v59 = vpop.permute.xlu0 %422 }
  0xca   : > { %v485_v62 = vsub.f32 %v419_v58, %v1698_v50  ;;  %v486_v63 = vsub.f32 %v423_v59, %v1698_v50 }
  0xcc   : > { %v549_v25 = vmul.f32 %v485_v62, %v485_v62  ;;  %v550_v27 = vmul.f32 %v486_v63, %v486_v63  ;;  %v522_v62 = vmul.f32 %v406_v48, %v406_v48  ;;  %v539_v63 = vadd.f32 %v523_v49, %v507_v55 }
  0xcd   : > { %v427_v35 = vpop.permute.xlu1 %426  ;;  %v435_v36 = vpop.permute.xlu0 %434 }
  0xce   : > { %v565_v37 = vadd.f32 %v549_v25, %v533_v24  ;;  %v566_v38 = vadd.f32 %v550_v27, %v534_v23  ;;  %v487_v40 = vsub.f32 %v427_v35, %v1698_v50  ;;  %v489_v43 = vsub.f32 %v435_v36, %v1698_v50 }
  0xcf   : > { %v506_v23 = vmul.f32 %v322_v54, %v322_v54  ;;  %v324_v25 = vsub.f32 %v1683_v30, %v1689_v42 }
  0xd0   : > { %v667_v26 = vsel %vm583_vm1, %v565_v37, 1e+30  ;;  %v668_v31 = vsel %vm583_vm1, %v566_v38, 1e+30  ;;  %v551_v51 = vmul.f32 %v487_v40, %v487_v40  ;;  %v553_v52 = vmul.f32 %v489_v43, %v489_v43 }
  0xd1   : > { %683 = vst [vmem:[#allocation2] sm:$0xff] %v667_v26  ;;  %684 = vst [vmem:[#allocation2 + $0x8] sm:$0xff] %v668_v31  ;;  %v431_v56 = vpop.permute.xlu1 %430  ;;  %v443_v57 = vpop.permute.xlu0 %442  ;;  %v538_v39 = vadd.f32 %v522_v62, %v506_v23  ;;  %v508_v37 = vmul.f32 %v324_v25, %v324_v25 }
  0xd2   : > { %v567_v58 = vadd.f32 %v551_v51, %v535_v44  ;;  %v569_v41 = vadd.f32 %v553_v52, %v537_v45  ;;  %v488_v59 = vsub.f32 %v431_v56, %v1698_v50  ;;  %v491_v60 = vsub.f32 %v443_v57, %v1698_v50 }
  0xd3   : > { %v540_v42 = vadd.f32 %v524_v46, %v508_v37 }
  0xd4   : > { %v669_v20 = vsel %vm583_vm1, %v567_v58, 1e+30  ;;  %v671_v28 = vsel %vm583_vm1, %v569_v41, 1e+30  ;;  %v552_v21 = vmul.f32 %v488_v59, %v488_v59  ;;  %v555_v22 = vmul.f32 %v491_v60, %v491_v60 }
  0xd5   : > { %685 = vst [vmem:[#allocation2 + $0x10] sm:$0xff] %v669_v20  ;;  %687 = vst [vmem:[#allocation2 + $0x20] sm:$0xff] %v671_v28  ;;  %v439_v24 = vpop.permute.xlu1 %438 }
  0xd6   : > { %v568_v27 = vadd.f32 %v552_v21, %v536_v61  ;;  %v571_v29 = vadd.f32 %v555_v22, %v539_v63  ;;  %v490_v32 = vsub.f32 %v439_v24, %v1698_v50 }
  0xd8   : > { %v670_v33 = vsel %vm583_vm1, %v568_v27, 1e+30  ;;  %v673_v34 = vsel %vm583_vm1, %v571_v29, 1e+30  ;;  %v554_v35 = vmul.f32 %v490_v32, %v490_v32 }
  0xd9   : > { %686 = vst [vmem:[#allocation2 + $0x18] sm:$0xff] %v670_v33  ;;  %689 = vst [vmem:[#allocation2 + $0x30] sm:$0xff] %v673_v34  ;;  %v447_v36 = vpop.permute.xlu1 %446 }
  0xda   : > { %v570_v38 = vadd.f32 %v554_v35, %v538_v39  ;;  %v492_v30 = vsub.f32 %v447_v36, %v1698_v50 }
  0xdc   : > { %v672_v40 = vsel %vm583_vm1, %v570_v38, 1e+30  ;;  %v556_v43 = vmul.f32 %v492_v30, %v492_v30 }
  0xdd   : > { %688 = vst [vmem:[#allocation2 + $0x28] sm:$0xff] %v672_v40 }
  0xde   : > { %v572_v44 = vadd.f32 %v556_v43, %v540_v42 }
  0xe0   : > { %v674_v45 = vsel %vm583_vm1, %v572_v44, 1e+30 }
  0xe1   : > { %690 = vst [vmem:[#allocation2 + $0x38] sm:$0xff] %v674_v45 }
  0xe2 PF: > { %s1740_s17 = sshll.u32 %s1501_s12, 2  ;;  %v1525_v47 = vmov 0   ;;  %s1526_s7 = smov 127   ;;  %vm1267_vm3 = vcmask 1040384   ;;  %vm1226_vm4 = vcmask 7168   ;;  %vm1285_vm6 = vcmask 57344  }
  0xe3   : > { %s710_s20 = sadd.s32 1, %s1740_s17  ;;  %s719_s21 = sadd.s32 2, %s1740_s17  ;;  %1458 = vset.pattern.permute.xlu0 %v1525_v47  ;;  %1459 = vset.pattern.permute.xlu1 %v1525_v47 }
  0xe4   : > { %s711_s22 = sshra.s32 %s710_s20, 7  ;;  %s716_s23 = sand.u32 127, %s710_s20 }
  0xe5   : > { %s713_s24 = sadd.s32 %s1505_s13, %s711_s22  ;;  %s720_s25 = sshra.s32 %s719_s21, 7 }
  0xe6   : > { %s1383_s26 = sshll.u32 %s713_s24, 7  ;;  %s722_s27 = sadd.s32 %s1505_s13, %s720_s25 }
  0xe7   : > { %s717_s28 = sadd.s32 %s1383_s26, %s716_s23  ;;  %s1384_s29 = sshll.u32 %s722_s27, 7 }
  0xe8   : > { %s718_s30 = sld [smem:[#allocation3 + %s717_s28]]  ;;  %s725_s4 = sand.u32 127, %s719_s21 }
  0xe9   : > { %s726_s5 = sadd.s32 %s1384_s29, %s725_s4  ;;  %s1527_s8 = smov 126  }
  0xea   : > { %s727_s6 = sld [smem:[#allocation3 + %s726_s5]]  ;;  %s702_s9 = sshra.s32 %s1740_s17, 7 }
  0xeb   : > { %s704_s10 = sadd.s32 %s1505_s13, %s702_s9  ;;  %s728_s20 = sadd.s32 3, %s1740_s17 }
  0xec   : > { %s1382_s21 = sshll.u32 %s704_s10, 7  ;;  %s707_s22 = sand.u32 127, %s1740_s17 }
  0xed   : > { %s729_s23 = sshra.s32 %s728_s20, 7  ;;  %s708_s24 = sadd.s32 %s1382_s21, %s707_s22 }
  0xee   : > { %v1746_v50 = vstv %s718_s30  ;;  %s731_s25 = sadd.s32 %s1505_s13, %s729_s23  ;;  %s709_s26 = sld [smem:[#allocation3 + %s708_s24]] }
  0xef   : > { %v766_v48 = vmul.f32 %v1746_v50, %v1627_v5  ;;  %v764_v49 = vmul.f32 %v1746_v50, %v1623_v3  ;;  %v765_v51 = vmul.f32 %v1746_v50, %v1625_v4  ;;  %v767_v52 = vmul.f32 %v1746_v50, %v1629_v6  ;;  %s1385_s27 = sshll.u32 %s731_s25, 7  ;;  %s734_s28 = sand.u32 127, %s728_s20 }
  0xf0   : > { %v1752_v26 = vstv %s727_s6  ;;  %v768_v54 = vmul.f32 %v1746_v50, %v1631_v7  ;;  %v769_v56 = vmul.f32 %v1746_v50, %v1633_v8  ;;  %v770_v58 = vmul.f32 %v1746_v50, %v1635_v9  ;;  %s735_s29 = sadd.s32 %s1385_s27, %s734_s28 }
  0xf1   : > { %800 = vrot.lane.b32.xlu1 %v766_v48, %s1526_s7  ;;  %796 = vrot.lane.b32.xlu0 %v764_v49, %s1526_s7  ;;  %v860_v31 = vmul.f32 %v1752_v26, %v1623_v3  ;;  %v861_v53 = vmul.f32 %v1752_v26, %v1625_v4  ;;  %v862_v55 = vmul.f32 %v1752_v26, %v1627_v5  ;;  %s736_s30 = sld [smem:[#allocation3 + %s735_s29]] }
  0xf2   : > { %v863_v57 = vmul.f32 %v1752_v26, %v1629_v6  ;;  %v864_v41 = vmul.f32 %v1752_v26, %v1631_v7  ;;  %v771_v59 = vmul.f32 %v1746_v50, %v1637_v10  ;;  %v865_v60 = vmul.f32 %v1752_v26, %v1633_v8 }
  0xf3   : > { %v867_v61 = vmul.f32 %v1752_v26, %v1637_v10  ;;  %v866_v62 = vmul.f32 %v1752_v26, %v1635_v9  ;;  %v773_v63 = vmul.f32 %v1746_v50, %v1641_v12  ;;  %v772_v19 = vmul.f32 %v1746_v50, %v1639_v11 }
  0xf4   : > { %v775_v20 = vmul.f32 %v1746_v50, %v1645_v14  ;;  %v774_v28 = vmul.f32 %v1746_v50, %v1643_v13  ;;  %v776_v21 = vmul.f32 %v1746_v50, %v1647_v15  ;;  %v777_v22 = vmul.f32 %v1746_v50, %v1649_v16 }
  0xf5   : > { %892 = vrot.lane.b32.xlu1 %v860_v31, %s1527_s8  ;;  %798 = vrot.lane.b32.xlu0 %v765_v51, %s1526_s7  ;;  %v778_v23 = vmul.f32 %v1746_v50, %v1651_v17  ;;  %v779_v24 = vmul.f32 %v1746_v50, %v1653_v18  ;;  %v868_v25 = vmul.f32 %v1752_v26, %v1639_v11  ;;  %v1851_v35 = vstv %s709_s26 }
  0xf6   : > { %v869_v27 = vmul.f32 %v1752_v26, %v1641_v12  ;;  %v870_v29 = vmul.f32 %v1752_v26, %v1643_v13  ;;  %v871_v32 = vmul.f32 %v1752_v26, %v1645_v14  ;;  %v873_v39 = vmul.f32 %v1752_v26, %v1649_v16 }
  0xf7   : > { %v872_v46 = vmul.f32 %v1752_v26, %v1647_v15  ;;  %v875_v33 = vmul.f32 %v1752_v26, %v1653_v18  ;;  %v874_v34 = vmul.f32 %v1752_v26, %v1651_v17  ;;  %v740_v36 = vmul.f32 %v1746_v50, %v1619_v1 }
  0xf8   : > { %v748_v37 = vmul.f32 %v1851_v35, %v1623_v3  ;;  %v743_v38 = vmul.f32 %v1752_v26, %v1621_v2  ;;  %v738_v30 = vmul.f32 %v1851_v35, %v1617_v0  ;;  %v749_v45 = vmul.f32 %v1851_v35, %v1625_v4 }
  0xf9   : > { %802 = vrot.lane.b32.xlu1 %v767_v52, %s1526_s7  ;;  %894 = vrot.lane.b32.xlu0 %v861_v53, %s1527_s8  ;;  %v1863_v48 = vstv %s736_s30  ;;  %v750_v2 = vmul.f32 %v1851_v35, %v1627_v5  ;;  %v752_v5 = vmul.f32 %v1851_v35, %v1631_v7  ;;  %v755_v7 = vmul.f32 %v1851_v35, %v1637_v10 }
  0xfa   : > { %v741_v43 = vadd.f32 %v740_v36, %v738_v30 }
  0xfc   : > { %v744_v47 = vadd.f32 %v743_v38, %v741_v43 }
  0xfd   : > { %804 = vrot.lane.b32.xlu1 %v768_v54, %s1526_s7  ;;  %896 = vrot.lane.b32.xlu0 %v862_v55, %s1527_s8  ;;  %v751_v54 = vmul.f32 %v1851_v35, %v1629_v6  ;;  %v753_v6 = vmul.f32 %v1851_v35, %v1633_v8 }
  0xfe   : > { %v1866_v3 = vadd.f32 %v1863_v48, %v744_v47 }
 0x101   : > { %806 = vrot.lane.b32.xlu1 %v769_v56, %s1526_s7  ;;  %898 = vrot.lane.b32.xlu0 %v863_v57, %s1527_s8 }
 0x105   : > { %808 = vrot.lane.b32.xlu1 %v770_v58, %s1526_s7  ;;  %900 = vrot.lane.b32.xlu0 %v864_v41, %s1527_s8 }
 0x109   : > { %810 = vrot.lane.b32.xlu1 %v771_v59, %s1526_s7  ;;  %902 = vrot.lane.b32.xlu0 %v865_v60, %s1527_s8 }
 0x10d   : > { %906 = vrot.lane.b32.xlu1 %v867_v61, %s1527_s8  ;;  %904 = vrot.lane.b32.xlu0 %v866_v62, %s1527_s8 }
 0x111   : > { %814 = vrot.lane.b32.xlu1 %v773_v63, %s1526_s7  ;;  %812 = vrot.lane.b32.xlu0 %v772_v19, %s1526_s7 }
 0x115   : > { %818 = vrot.lane.b32.xlu1 %v775_v20, %s1526_s7  ;;  %816 = vrot.lane.b32.xlu0 %v774_v28, %s1526_s7 }
 0x119   : > { %820 = vrot.lane.b32.xlu1 %v776_v21, %s1526_s7  ;;  %822 = vrot.lane.b32.xlu0 %v777_v22, %s1526_s7 }
 0x11d   : > { %824 = vrot.lane.b32.xlu1 %v778_v23, %s1526_s7  ;;  %826 = vrot.lane.b32.xlu0 %v779_v24, %s1526_s7 }
 0x121   : > { %908 = vrot.lane.b32.xlu1 %v868_v25, %s1527_s8  ;;  %910 = vrot.lane.b32.xlu0 %v869_v27, %s1527_s8  ;;  %v754_v27 = vmul.f32 %v1851_v35, %v1635_v9 }
 0x125   : > { %912 = vrot.lane.b32.xlu1 %v870_v29, %s1527_s8  ;;  %914 = vrot.lane.b32.xlu0 %v871_v32, %s1527_s8 }
 0x129   : > { %918 = vrot.lane.b32.xlu1 %v873_v39, %s1527_s8  ;;  %916 = vrot.lane.b32.xlu0 %v872_v46, %s1527_s8 }
 0x12d   : > { %922 = vrot.lane.b32.xlu1 %v875_v33, %s1527_s8  ;;  %920 = vrot.lane.b32.xlu0 %v874_v34, %s1527_s8 }
 0x163   : > { %v801_v42 = vpop.permute.xlu1 %800  ;;  %v797_v40 = vpop.permute.xlu0 %796 }
 0x164   : > { %v844_v44 = vadd.f32 %v797_v40, %v748_v37  ;;  %v846_v4 = vadd.f32 %v801_v42, %v750_v2 }
 0x167   : > { %v893_v1 = vpop.permute.xlu1 %892  ;;  %v799_v50 = vpop.permute.xlu0 %798 }
 0x168   : > { %v940_v49 = vadd.f32 %v893_v1, %v844_v44  ;;  %v845_v26 = vadd.f32 %v799_v50, %v749_v45 }
 0x16a   : > { %v956_v0 = vadd.f32 %v940_v49, %v1863_v48 }
 0x16b   : > { %v803_v31 = vpop.permute.xlu1 %802  ;;  %v895_v51 = vpop.permute.xlu0 %894 }
 0x16c   : > { %v972_v52 = vmul.f32 2.0, %v956_v0  ;;  %v941_v53 = vadd.f32 %v895_v51, %v845_v26  ;;  %v847_v59 = vadd.f32 %v803_v31, %v751_v54  ;;  %v757_v0 = vmul.f32 %v1851_v35, %v1641_v12 }
 0x16d   : > { %v756_v26 = vmul.f32 %v1851_v35, %v1639_v11  ;;  %v758_v54 = vmul.f32 %v1851_v35, %v1643_v13  ;;  %v762_v13 = vmul.f32 %v1851_v35, %v1651_v17 }
 0x16e   : > { %v957_v55 = vadd.f32 %v941_v53, %v1863_v48  ;;  %1006 = vperm.xlu0 %1458, %v972_v52  }
 0x16f   : > { %v805_v56 = vpop.permute.xlu1 %804  ;;  %v897_v57 = vpop.permute.xlu0 %896 }
 0x170   : > { %v973_v58 = vmul.f32 2.0, %v957_v55  ;;  %v942_v41 = vadd.f32 %v897_v57, %v846_v4  ;;  %v848_v20 = vadd.f32 %v805_v56, %v752_v5  ;;  %v759_v4 = vmul.f32 %v1851_v35, %v1645_v14 }
 0x171   : > { %v760_v55 = vmul.f32 %v1851_v35, %v1647_v15  ;;  %v761_v56 = vmul.f32 %v1851_v35, %v1649_v16  ;;  %v763_v15 = vmul.f32 %v1851_v35, %v1653_v18 }
 0x172   : > { %v958_v60 = vadd.f32 %v942_v41, %v1863_v48  ;;  %1011 = vperm.xlu1 %1459, %v973_v58  }
 0x173   : > { %v807_v61 = vpop.permute.xlu1 %806  ;;  %v899_v62 = vpop.permute.xlu0 %898 }
 0x174   : > { %v974_v63 = vmul.f32 2.0, %v958_v60  ;;  %v943_v19 = vadd.f32 %v899_v62, %v847_v59  ;;  %v849_v25 = vadd.f32 %v807_v61, %v753_v6 }
 0x176   : > { %v959_v28 = vadd.f32 %v943_v19, %v1863_v48  ;;  %1016 = vperm.xlu1 %1459, %v974_v63  }
 0x177   : > { %v809_v21 = vpop.permute.xlu1 %808  ;;  %v901_v22 = vpop.permute.xlu0 %900 }
 0x178   : > { %v975_v23 = vmul.f32 2.0, %v959_v28  ;;  %v944_v24 = vadd.f32 %v901_v22, %v848_v20  ;;  %v850_v34 = vadd.f32 %v809_v21, %v754_v27 }
 0x17a   : > { %v960_v29 = vadd.f32 %v944_v24, %v1863_v48  ;;  %1021 = vperm.xlu0 %1458, %v975_v23  }
 0x17b   : > { %v811_v32 = vpop.permute.xlu1 %810  ;;  %v903_v39 = vpop.permute.xlu0 %902 }
 0x17c   : > { %v976_v8 = vmul.f32 2.0, %v960_v29  ;;  %v851_v46 = vadd.f32 %v811_v32, %v755_v7  ;;  %v945_v33 = vadd.f32 %v903_v39, %v849_v25 }
 0x17e   : > { %v961_v36 = vadd.f32 %v945_v33, %v1863_v48  ;;  %1026 = vperm.xlu1 %1459, %v976_v8  }
 0x17f   : > { %v907_v37 = vpop.permute.xlu1 %906  ;;  %v905_v38 = vpop.permute.xlu0 %904 }
 0x180   : > { %v977_v30 = vmul.f32 2.0, %v961_v36  ;;  %v947_v10 = vadd.f32 %v907_v37, %v851_v46  ;;  %v946_v42 = vadd.f32 %v905_v38, %v850_v34 }
 0x182   : > { %v963_v40 = vadd.f32 %v947_v10, %v1863_v48  ;;  %v962_v9 = vadd.f32 %v946_v42, %v1863_v48  ;;  %1031 = vperm.xlu0 %1458, %v977_v30   ;;  %v1084_v10 = vlaneseq }
 0x183   : > { %v815_v43 = vpop.permute.xlu1 %814  ;;  %v813_v44 = vpop.permute.xlu0 %812 }
 0x184   : > { %v979_v45 = vmul.f32 2.0, %v963_v40  ;;  %v978_v47 = vmul.f32 2.0, %v962_v9  ;;  %v853_v52 = vadd.f32 %v815_v43, %v757_v0  ;;  %v852_v53 = vadd.f32 %v813_v44, %v756_v26  ;;  %v990_v26 = vld [vmem:[#allocation2 + $0x10] sm:$0xff] }
 0x185   : > { %v1085_v42 = vshrl.u32 %v1084_v10, 7  ;;  %v747_v9 = vmul.f32 2.0, %v1866_v3 }
 0x186   : > { %1036 = vperm.xlu1 %1459, %v978_v47   ;;  %1041 = vperm.xlu0 %1458, %v979_v45   ;;  %v988_v45 = vld [vmem:[#allocation2] sm:$0xff] }
 0x187   : > { %v819_v1 = vpop.permute.xlu1 %818  ;;  %v817_v50 = vpop.permute.xlu0 %816  ;;  %v1086_v40 = vsub.s32 0, %v1085_v42 }
 0x188   : > { %v855_v58 = vadd.f32 %v819_v1, %v759_v4  ;;  %v854_v11 = vadd.f32 %v817_v50, %v758_v54  ;;  %v989_v50 = vld [vmem:[#allocation2 + $0x8] sm:$0xff] }
 0x189   : > { %v1914_v43 = vrot.slane %v747_v9, %v1086_v40  ;;  %v1002_v40 = vld [vmem:[#allocation2 + $0x70] sm:$0xff] }
 0x18b   : > { %v821_v49 = vpop.permute.xlu1 %820  ;;  %v823_v2 = vpop.permute.xlu0 %822 }
 0x18c   : > { %v856_v14 = vadd.f32 %v821_v49, %v760_v55  ;;  %v857_v61 = vadd.f32 %v823_v2, %v761_v56  ;;  %v992_v55 = vld [vmem:[#allocation2 + $0x20] sm:$0xff] }
 0x18f   : > { %v825_v31 = vpop.permute.xlu1 %824  ;;  %v827_v51 = vpop.permute.xlu0 %826 }
 0x190   : > { %v858_v22 = vadd.f32 %v825_v31, %v762_v13  ;;  %v859_v23 = vadd.f32 %v827_v51, %v763_v15 }
 0x193   : > { %v909_v12 = vpop.permute.xlu1 %908  ;;  %v911_v57 = vpop.permute.xlu0 %910 }
 0x194   : > { %v948_v41 = vadd.f32 %v909_v12, %v852_v53  ;;  %v949_v59 = vadd.f32 %v911_v57, %v853_v52  ;;  %v991_v52 = vld [vmem:[#allocation2 + $0x18] sm:$0xff] }
 0x196   : > { %v964_v5 = vadd.f32 %v948_v41, %v1863_v48  ;;  %v965_v60 = vadd.f32 %v949_v59, %v1863_v48 }
 0x197   : > { %v913_v62 = vpop.permute.xlu1 %912  ;;  %v915_v16 = vpop.permute.xlu0 %914 }
 0x198   : > { %v980_v63 = vmul.f32 2.0, %v964_v5  ;;  %v981_v19 = vmul.f32 2.0, %v965_v60  ;;  %v950_v20 = vadd.f32 %v913_v62, %v854_v11  ;;  %v951_v6 = vadd.f32 %v915_v16, %v855_v58  ;;  %v993_v58 = vld [vmem:[#allocation2 + $0x28] sm:$0xff]  ;;  %v994_v60 = vld [vmem:[#allocation2 + $0x30] sm:$0xff] }
 0x19a   : > { %v966_v28 = vadd.f32 %v950_v20, %v1863_v48  ;;  %v967_v21 = vadd.f32 %v951_v6, %v1863_v48  ;;  %1046 = vperm.xlu1 %1459, %v980_v63   ;;  %1051 = vperm.xlu0 %1458, %v981_v19  }
 0x19b   : > { %v919_v24 = vpop.permute.xlu1 %918  ;;  %v917_v7 = vpop.permute.xlu0 %916 }
 0x19c   : > { %v982_v17 = vmul.f32 2.0, %v966_v28  ;;  %v983_v25 = vmul.f32 2.0, %v967_v21  ;;  %v953_v27 = vadd.f32 %v919_v24, %v857_v61  ;;  %v952_v18 = vadd.f32 %v917_v7, %v856_v14  ;;  %v995_v14 = vld [vmem:[#allocation2 + $0x38] sm:$0xff]  ;;  %v996_v21 = vld [vmem:[#allocation2 + $0x40] sm:$0xff]  ;;  %v998_v7 = vld [vmem:[#allocation2 + $0x50] sm:$0xff] }
 0x19e   : > { %v969_v35 = vadd.f32 %v953_v27, %v1863_v48  ;;  %v968_v29 = vadd.f32 %v952_v18, %v1863_v48  ;;  %1056 = vperm.xlu1 %1459, %v982_v17   ;;  %1061 = vperm.xlu0 %1458, %v983_v25   ;;  %v999_v17 = vld [vmem:[#allocation2 + $0x58] sm:$0xff]  ;;  %v1000_v25 = vld [vmem:[#allocation2 + $0x60] sm:$0xff]  ;;  %v1001_v18 = vld [vmem:[#allocation2 + $0x68] sm:$0xff] }
 0x19f   : > { %v923_v32 = vpop.permute.xlu1 %922  ;;  %v921_v39 = vpop.permute.xlu0 %920 }
 0x1a0   : > { %v985_v8 = vmul.f32 2.0, %v969_v35  ;;  %v984_v46 = vmul.f32 2.0, %v968_v29  ;;  %v955_v33 = vadd.f32 %v923_v32, %v859_v23  ;;  %v954_v34 = vadd.f32 %v921_v39, %v858_v22  ;;  %v997_v22 = vld [vmem:[#allocation2 + $0x48] sm:$0xff] }
 0x1a2   : > { %v971_v36 = vadd.f32 %v955_v33, %v1863_v48  ;;  %v970_v37 = vadd.f32 %v954_v34, %v1863_v48  ;;  %1066 = vperm.xlu1 %1459, %v984_v46   ;;  %1071 = vperm.xlu0 %1458, %v985_v8  }
 0x1a4   : > { %v987_v38 = vmul.f32 2.0, %v971_v36  ;;  %v986_v30 = vmul.f32 2.0, %v970_v37 }
 0x1a6   : > { %1076 = vperm.xlu1 %1459, %v986_v30   ;;  %1081 = vperm.xlu0 %1458, %v987_v38  }
 0x1ed   : > { %v1007_v44 = vpop.permute.xlu0 %1006 }
 0x1ee   : > { %v1088_v47 = vmul.f32 %v1914_v43, %v1007_v44  ;;  %v1003_v44 = vld [vmem:[#allocation2 + $0x78] sm:$0xff] }
 0x1f0   : > { %v1917_v1 = vadd.f32 %v1088_v47, %v988_v45 }
 0x1f1   : > { %v1012_v48 = vpop.permute.xlu1 %1011 }
 0x1f2   : > { %v1089_v49 = vmul.f32 %v1914_v43, %v1012_v48  ;;  %1120 = vmin.xlane.f32.xlu1 %v1917_v1 }
 0x1f4   : > { %v1921_v2 = vadd.f32 %v1089_v49, %v989_v50 }
 0x1f5   : > { %v1017_v0 = vpop.permute.xlu1 %1016 }
 0x1f6   : > { %v1090_v3 = vmul.f32 %v1914_v43, %v1017_v0  ;;  %1122 = vmin.xlane.f32.xlu0 %v1921_v2 }
 0x1f8   : > { %v1925_v31 = vadd.f32 %v1090_v3, %v990_v26 }
 0x1f9   : > { %v1022_v51 = vpop.permute.xlu0 %1021 }
 0x1fa   : > { %v1091_v53 = vmul.f32 %v1914_v43, %v1022_v51  ;;  %1124 = vmin.xlane.f32.xlu0 %v1925_v31 }
 0x1fc   : > { %v1107_v4 = vadd.f32 %v1091_v53, %v991_v52 }
 0x1fd   : > { %v1027_v54 = vpop.permute.xlu1 %1026 }
 0x1fe   : > { %v1092_v56 = vmul.f32 %v1914_v43, %v1027_v54  ;;  %1126 = vmin.xlane.f32.xlu1 %v1107_v4 }
 0x200   : > { %v1108_v12 = vadd.f32 %v1092_v56, %v992_v55 }
 0x201   : > { %v1032_v57 = vpop.permute.xlu0 %1031 }
 0x202   : > { %v1093_v11 = vmul.f32 %v1914_v43, %v1032_v57  ;;  %1128 = vmin.xlane.f32.xlu0 %v1108_v12  ;;  %v1152_v34 = vmin.f32 %v1917_v1, %v1108_v12  ;;  %v1174_v57 = vand.u32 127, %v1084_v10 }
 0x204   : > { %v1109_v41 = vadd.f32 %v1093_v11, %v993_v58  ;;  %vm1175_vm2 = vcmp.lt.s32.totalorder %v1174_v57, 64 }
 0x205   : > { %v1037_v59 = vpop.permute.xlu1 %1036  ;;  %v1042_v5 = vpop.permute.xlu0 %1041 }
 0x206   : > { %v1094_v61 = vmul.f32 %v1914_v43, %v1037_v59  ;;  %v1095_v13 = vmul.f32 %v1914_v43, %v1042_v5  ;;  %1130 = vmin.xlane.f32.xlu1 %v1109_v41  ;;  %v1153_v36 = vmin.f32 %v1921_v2, %v1109_v41 }
 0x208   : > { %v1110_v15 = vadd.f32 %v1094_v61, %v994_v60  ;;  %v1111_v62 = vadd.f32 %v1095_v13, %v995_v14 }
 0x20a   : > { %1132 = vmin.xlane.f32.xlu0 %v1110_v15  ;;  %1134 = vmin.xlane.f32.xlu1 %v1111_v62  ;;  %v1154_v30 = vmin.f32 %v1925_v31, %v1110_v15  ;;  %v1155_v42 = vmin.f32 %v1107_v4, %v1111_v62 }
 0x219   : > { %v1047_v16 = vpop.permute.xlu1 %1046  ;;  %v1052_v63 = vpop.permute.xlu0 %1051 }
 0x21a   : > { %v1096_v6 = vmul.f32 %v1914_v43, %v1047_v16  ;;  %v1097_v28 = vmul.f32 %v1914_v43, %v1052_v63 }
 0x21c   : > { %v1112_v29 = vadd.f32 %v1096_v6, %v996_v21  ;;  %v1113_v32 = vadd.f32 %v1097_v28, %v997_v22 }
 0x21d   : > { %v1057_v19 = vpop.permute.xlu1 %1056  ;;  %v1062_v20 = vpop.permute.xlu0 %1061 }
 0x21e   : > { %v1098_v23 = vmul.f32 %v1914_v43, %v1057_v19  ;;  %v1099_v24 = vmul.f32 %v1914_v43, %v1062_v20  ;;  %v1156_v47 = vmin.f32 %v1152_v34, %v1112_v29  ;;  %v1157_v48 = vmin.f32 %v1153_v36, %v1113_v32 }
 0x220   : > { %v1114_v46 = vadd.f32 %v1098_v23, %v998_v7  ;;  %v1115_v33 = vadd.f32 %v1099_v24, %v999_v17 }
 0x221   : > { %v1067_v27 = vpop.permute.xlu1 %1066  ;;  %v1072_v35 = vpop.permute.xlu0 %1071 }
 0x222   : > { %v1100_v39 = vmul.f32 %v1914_v43, %v1067_v27  ;;  %v1101_v8 = vmul.f32 %v1914_v43, %v1072_v35  ;;  %v1158_v0 = vmin.f32 %v1154_v30, %v1114_v46  ;;  %v1159_v26 = vmin.f32 %v1155_v42, %v1115_v33 }
 0x224   : > { %v1116_v37 = vadd.f32 %v1100_v39, %v1000_v25  ;;  %v1117_v38 = vadd.f32 %v1101_v8, %v1001_v18 }
 0x225   : > { %v1077_v9 = vpop.permute.xlu1 %1076  ;;  %v1082_v45 = vpop.permute.xlu0 %1081 }
 0x226   : > { %v1102_v50 = vmul.f32 %v1914_v43, %v1077_v9  ;;  %v1103_v49 = vmul.f32 %v1914_v43, %v1082_v45  ;;  %v1160_v1 = vmin.f32 %v1156_v47, %v1116_v37  ;;  %v1161_v3 = vmin.f32 %v1157_v48, %v1117_v38 }
 0x227   : > { %v1280_v9 = vstv %s1501_s12 }
 0x228   : > { %v1118_v2 = vadd.f32 %v1102_v50, %v1002_v40  ;;  %v1119_v51 = vadd.f32 %v1103_v49, %v1003_v44  ;;  %v1164_v31 = vmin.f32 %v1160_v1, %v1161_v3  ;;  %vm1281_vm5 = vcmp.eq.s32.totalorder %v1174_v57, %v1280_v9  ;;  %v1282_v44 = vld [vmem:[%s1615_s11] sm:$0x1] }
 0x22a   : > { %v1162_v52 = vmin.f32 %v1158_v0, %v1118_v2  ;;  %v1163_v53 = vmin.f32 %v1159_v26, %v1119_v51 }
 0x22c   : > { %v1165_v4 = vmin.f32 %v1162_v52, %v1163_v53 }
 0x22e   : > { %v1166_v54 = vmin.f32 %v1164_v31, %v1165_v4 }
 0x230   : > { %v1167_v55 = vrot.slane %v1166_v54, 4 }
 0x232   : > { %v1168_v56 = vmin.f32 %v1166_v54, %v1167_v55 }
 0x234   : > { %v1169_v12 = vrot.slane %v1168_v56, 2 }
 0x236   : > { %v1170_v58 = vmin.f32 %v1168_v56, %v1169_v12 }
 0x238   : > { %v1171_v11 = vrot.slane %v1170_v58, 1 }
 0x23a   : > { %v1172_v43 = vmin.f32 %v1170_v58, %v1171_v11 }
 0x23c   : > { %v1225_v41 = vsel %vm1175_vm2, %v1172_v43, 0.0 }
 0x23d   : > { %v1268_v59 = vsel %vm1267_vm3, %v1225_v41, 0.0 }
 0x23e   : > { %1269 = vadd.xlane.f32.xlu1 %v1268_v59 }
 0x27f   : > { %v1121_v60 = vpop.xlane.xlu1 %1120 }
 0x280   : > { %v1227_v15 = vsel %vm1226_vm4, %v1121_v60, 0.0 }
 0x283   : > { %v1123_v5 = vpop.xlane.xlu0 %1122 }
 0x284   : > { %v1228_v61 = vsel %vm1226_vm4, %v1123_v5, 0.0 }
 0x285   : > { %v1229_v10 = vadd.f32 %v1228_v61, %v1227_v15 }
 0x287   : > { %v1125_v14 = vpop.xlane.xlu0 %1124 }
 0x288   : > { %v1230_v62 = vsel %vm1226_vm4, %v1125_v14, 0.0 }
 0x289   : > { %v1231_v19 = vadd.f32 %v1230_v62, %v1229_v10 }
 0x28b   : > { %v1127_v13 = vpop.xlane.xlu1 %1126 }
 0x28c   : > { %v1232_v63 = vsel %vm1226_vm4, %v1127_v13, 0.0 }
 0x28d   : > { %v1233_v6 = vadd.f32 %v1232_v63, %v1231_v19 }
 0x28f   : > { %v1129_v16 = vpop.xlane.xlu0 %1128 }
 0x290   : > { %v1234_v20 = vsel %vm1226_vm4, %v1129_v16, 0.0 }
 0x291   : > { %v1235_v22 = vadd.f32 %v1234_v20, %v1233_v6 }
 0x293   : > { %v1131_v28 = vpop.xlane.xlu1 %1130 }
 0x294   : > { %v1236_v21 = vsel %vm1226_vm4, %v1131_v28, 0.0 }
 0x295   : > { %v1237_v23 = vadd.f32 %v1236_v21, %v1235_v22 }
 0x297   : > { %v1133_v24 = vpop.xlane.xlu0 %1132  ;;  %v1135_v7 = vpop.xlane.xlu1 %1134 }
 0x298   : > { %v1238_v17 = vsel %vm1226_vm4, %v1133_v24, 0.0  ;;  %v1240_v27 = vsel %vm1226_vm4, %v1135_v7, 0.0 }
 0x299   : > { %v1239_v25 = vadd.f32 %v1238_v17, %v1237_v23 }
 0x29b   : > { %v1241_v18 = vadd.f32 %v1240_v27, %v1239_v25 }
 0x29d   : > { %1258 = vadd.xlane.f32.xlu0 %v1241_v18 }
 0x2cb   : > { %v1270_v35 = vpop.xlane.xlu1 %1269 }
 0x2cc   : > { %v1271_v29 = vrot.slane %v1270_v35, 4 }
 0x2ce   : > { %v1272_v32 = vadd.f32 %v1271_v29, %v1270_v35 }
 0x2d0   : > { %v1273_v39 = vrot.slane %v1272_v32, 2 }
 0x2d2   : > { %v1274_v34 = vadd.f32 %v1273_v39, %v1272_v32 }
 0x2d4   : > { %v1275_v38 = vrot.slane %v1274_v34, 1 }
 0x2d6   : > { %v1276_v40 = vadd.f32 %v1275_v38, %v1274_v34 }
 0x32a   : > { %v1259_v8 = vpop.xlane.xlu0 %1258 }
 0x32b   : > { %v1260_v46 = vrot.slane %v1259_v8, 4 }
 0x32d   : > { %v1261_v33 = vadd.f32 %v1260_v46, %v1259_v8 }
 0x32f   : > { %v1262_v36 = vrot.slane %v1261_v33, 2 }
 0x331   : > { %v1263_v37 = vadd.f32 %v1262_v36, %v1261_v33 }
 0x333   : > { %v1264_v30 = vrot.slane %v1263_v37, 1 }
 0x335   : > { %v1265_v42 = vadd.f32 %v1264_v30, %v1263_v37 }
 0x337   : > { %1389 = vpush %v1265_v42 }
 0x338   : > { %1391 = vpush %v1276_v40 }
 0x368   : > { %s1390_s13 = spop %1389 }
 0x369   : > { %s1392_s17 = spop %1391 }
 0x36a   : > { %s1278_s4 = sadd.f32 %s1392_s17, %s1390_s13 }
 0x36c   : > { %s1279_s5 = smul.f32 0.015625, %s1278_s4 }
 0x36e   : > { %v1283_v45 = vstv %s1279_s5 }
 0x36f   : > { %v1284_v47 = vsel %vm1281_vm5, %v1283_v45, %v1282_v44 }
 0x370   : > { %1286 = vst.msk [vmem:[%s1615_s11] sm:$0x1] %vm1285_vm6, %v1284_v47 }
 0x371 PF: > { %s14_s16 = sadd.s32 1, %s1517_s16   ;;  %s1977_s12 = smov %s1509_s14 }
 0x372   : > { %p11_p4 = scmp.ge.s32.totalorder %s14_s16, 18   ;;  %s1978_s13 = smov %s1513_s15 }
 0x373   : > { %s1979_s14 = smov %s1982_s18  ;;  %s1980_s15 = smov %s1986_s19 }
 0x374   :  { %13 = sbr.rel (!%p11_p4) target bundleno = 3 (0x3), region = 74 }
 0x37b   :  { %1304 = vsyncpa [#allocation4], 1 }
 0x37c   :  { %1306 = vsyncpa [#allocation4 + $0x1], 1 }

</bundles_post_ra>
